<compile_context>
chip_gen: v6e
topology: v6e:2x2x1
jax: 0.10.0
libtpu: 0.0.40
codegen_flags: <defaults>
</compile_context>

<pallas_src>
import functools

import jax
import jax.numpy as jnp
from jax.experimental import pallas as pl
from jax.experimental.pallas import tpu as pltpu

# Logical (PyTorch) dims
IN_DIM = 9
H = 100
OUT_DIM = 2

# Padded dims used by the kernel
H_PAD = 128      # hidden lanes (lane-dense, multiple of 128)
OUT_COLS = 8     # padded output lanes (2 real + 6 zero); tiny f32 writeback


def _round_up(n, m):
    return ((n + m - 1) // m) * m


def _log_sigmoid(x):
    # log(sigmoid(x)) = -softplus(-x), numerically stable form:
    #   min(x, 0) - log1p(exp(-|x|))
    return jnp.minimum(x, jnp.zeros_like(x)) - jnp.log1p(jnp.exp(-jnp.abs(x)))


def _bf16_act_supported():
    """bf16 VPU/EUP only on v6e / v7x; keep f32 activation math elsewhere."""
    try:
        kind = jax.devices()[0].device_kind.lower()
    except Exception:
        return False
    return ("v6" in kind) or ("v7" in kind)


def mlp_kernel(x_ref, w1_ref, b1_ref, w2_ref, b2_ref, w3_ref, b3_ref, o_ref,
               *, act_dtype):
    # Fused input cast: x tile arrives as f32 (TM, 9), cast to bf16 for the MXU.
    x = x_ref[...].astype(jnp.bfloat16)                               # (TM, 9)

    # layer1: (TM,9)@(9,128) bf16 MXU, f32 accumulate.
    z1 = jnp.dot(x, w1_ref[...], preferred_element_type=jnp.float32) + b1_ref[...]
    h1 = _log_sigmoid(z1.astype(act_dtype)).astype(jnp.bfloat16)      # (TM, 128)

    # layer2: (TM,128)@(128,128)
    z2 = jnp.dot(h1, w2_ref[...], preferred_element_type=jnp.float32) + b2_ref[...]
    h2 = _log_sigmoid(z2.astype(act_dtype)).astype(jnp.bfloat16)      # (TM, 128)

    # layer3: (TM,128)@(128,8) -- only lanes [:2] are real, rest are zero cols.
    z3 = jnp.dot(h2, w3_ref[...], preferred_element_type=jnp.float32) + b3_ref[...]
    o_ref[...] = z3.astype(o_ref.dtype)                               # (TM, 8) f32


def init_params(key):
    """f32 params at logical nn.Linear shapes, stored (in, out) layout."""
    ks = jax.random.split(key, 6)

    def linear(kw, kb, fan_in, fan_out):
        bound = 1.0 / jnp.sqrt(float(fan_in))
        w = jax.random.uniform(kw, (fan_in, fan_out), jnp.float32, -bound, bound)
        b = jax.random.uniform(kb, (1, fan_out), jnp.float32, -bound, bound)
        return w, b

    w1, b1 = linear(ks[0], ks[1], IN_DIM, H)
    w2, b2 = linear(ks[2], ks[3], H, H)
    w3, b3 = linear(ks[4], ks[5], H, OUT_DIM)
    return {"w1": w1, "b1": b1, "w2": w2, "b2": b2, "w3": w3, "b3": b3}


def pack_params(p):
    """Zero-pad to kernel shapes; weights -> bf16 (MXU), biases stay f32.

    Invariant (correctness): all padded rows/cols are exactly zero, so the
    padded hidden lanes (which evaluate to log_sigmoid(0) = -0.693) never
    leak into real outputs (w2/w3 rows 100..127 are zero), and output lanes
    2..7 stay inert.
    """
    def pad(a, shape):
        out = jnp.zeros(shape, a.dtype)
        return out.at[: a.shape[0], : a.shape[1]].set(a)

    return {
        "w1": pad(p["w1"], (IN_DIM, H_PAD)).astype(jnp.bfloat16),
        "b1": pad(p["b1"], (1, H_PAD)),
        "w2": pad(p["w2"], (H_PAD, H_PAD)).astype(jnp.bfloat16),
        "b2": pad(p["b2"], (1, H_PAD)),
        "w3": pad(p["w3"], (H_PAD, OUT_COLS)).astype(jnp.bfloat16),
        "b3": pad(p["b3"], (1, OUT_COLS)),
    }


def _choose_tiling(B, tm_max):
    """Pick (TM, Bp, ngrid): limits batch over-padding to <= 8*ngrid rows and
    gives >=2 grid steps for large B (so v7x can shard the parallel axis)."""
    ngrid = max(-(-B // tm_max), 1)
    if B >= 2048 and ngrid < 2:
        ngrid = 2
    TM = _round_up(-(-B // ngrid), 8)
    Bp = ngrid * TM
    return TM, Bp, ngrid


@functools.partial(jax.jit, static_argnames=("tm_max", "act_bf16"))
def _mlp_forward(x, packed, tm_max, act_bf16):
    B = x.shape[0]
    TM, Bp, ngrid = _choose_tiling(B, tm_max)
    act_dtype = jnp.bfloat16 if act_bf16 else jnp.float32

    # Only batch-row padding (if needed); feature cast/pad happens in-kernel.
    if Bp != B:
        xp = jnp.zeros((Bp, IN_DIM), x.dtype).at[:B].set(x)
    else:
        xp = x

    w1, b1 = packed["w1"], packed["b1"]
    w2, b2 = packed["w2"], packed["b2"]
    w3, b3 = packed["w3"], packed["b3"]

    # Weights/biases: full-array blocks with constant index_map -> stay
    # VMEM-resident across grid steps (no per-step re-DMA).
    resident = lambda a: pl.BlockSpec(a.shape, lambda i: (0, 0))

    flops = 2 * Bp * (IN_DIM * H_PAD + H_PAD * H_PAD + H_PAD * OUT_COLS)
    transcendentals = 4 * Bp * H_PAD  # exp + log1p per element, two LogSigmoids
    bytes_accessed = (
        Bp * IN_DIM * 4
        + sum(a.size * a.dtype.itemsize for a in (w1, b1, w2, b2, w3, b3))
        + Bp * OUT_COLS * 4
    )

    out = pl.pallas_call(
        functools.partial(mlp_kernel, act_dtype=act_dtype),
        out_shape=jax.ShapeDtypeStruct((Bp, OUT_COLS), jnp.float32),
        grid=(ngrid,),
        in_specs=[
            pl.BlockSpec((TM, IN_DIM), lambda i: (i, 0)),   # x tile, pipelined
            resident(w1), resident(b1),
            resident(w2), resident(b2),
            resident(w3), resident(b3),
        ],
        out_specs=pl.BlockSpec((TM, OUT_COLS), lambda i: (i, 0)),
        compiler_params=pltpu.CompilerParams(
            # Megacore sharding of the batch axis on v7x (no-op on v5e/v6e).
            dimension_semantics=("parallel",),
        ),
        cost_estimate=pl.CostEstimate(
            flops=flops,
            transcendentals=transcendentals,
            bytes_accessed=bytes_accessed,
        ),
    )(xp, w1, b1, w2, b2, w3, b3)

    return out[:B, :OUT_DIM]


def mlp_forward(x, packed, tm_max=4096, act_bf16=None):
    """x: (B, 9) f32; packed: output of pack_params. Returns (B, 2) f32."""
    if act_bf16 is None:
        act_bf16 = _bf16_act_supported()
    return _mlp_forward(x, packed, tm_max, act_bf16)


def reference_forward(x, packed, act_bf16):
    """Plain-JAX reference mirroring the kernel's precision exactly
    (bf16 weights / bf16 matmul inputs, f32 accumulation, act_dtype math)."""
    act_dtype = jnp.bfloat16 if act_bf16 else jnp.float32
    xb = x.astype(jnp.bfloat16)
    z1 = jnp.dot(xb, packed["w1"], preferred_element_type=jnp.float32) + packed["b1"]
    h1 = _log_sigmoid(z1.astype(act_dtype)).astype(jnp.bfloat16)
    z2 = jnp.dot(h1, packed["w2"], preferred_element_type=jnp.float32) + packed["b2"]
    h2 = _log_sigmoid(z2.astype(act_dtype)).astype(jnp.bfloat16)
    z3 = jnp.dot(h2, packed["w3"], preferred_element_type=jnp.float32) + packed["b3"]
    return z3[:, :OUT_DIM]


def reference_forward_f32(x, p):
    """Full-f32 reference of the original PyTorch module semantics."""
    h1 = _log_sigmoid(x @ p["w1"] + p["b1"])
    h2 = _log_sigmoid(h1 @ p["w2"] + p["b2"])
    return h2 @ p["w3"] + p["b3"]


if __name__ == "__main__":
    key = jax.random.PRNGKey(0)
    k_x, k_p = jax.random.split(key)

    B = 8
    # Inputs in [0, 1] (the PyTorch script MinMax-scales its features).
    # TODO(synk): MinMaxScaler lives outside MyModule.forward and is not part of the kernel.
    x = jax.random.uniform(k_x, (B, IN_DIM), jnp.float32)

    params = init_params(k_p)
    packed = pack_params(params)

    act_bf16 = _bf16_act_supported()

    out = mlp_forward(x, packed, act_bf16=act_bf16)
    out = jax.block_until_ready(out)
    assert out.shape == (B, OUT_DIM)

    # Near-exact check against a precision-mirrored reference.
    ref = reference_forward(x, packed, act_bf16)
    assert jnp.allclose(out, ref, atol=1e-3, rtol=1e-3), float(jnp.max(jnp.abs(out - ref)))

    # Loose semantic check against the full-f32 PyTorch-equivalent math
    # (difference is only the intended bf16 weight/activation quantization).
    ref32 = reference_forward_f32(x, params)
    assert jnp.allclose(out, ref32, atol=1e-1, rtol=1e-1), float(jnp.max(jnp.abs(out - ref32)))

    print("KERNEL_OK")
</pallas_src>

<mosaic_0001>
module attributes {stable_mosaic.version = 11 : i64} {
  func.func @mlp_kernel(%arg0: i32, %arg1: memref<8x9xf32, #tpu.memory_space<vmem>>, %arg2: memref<9x128xbf16, #tpu.memory_space<vmem>>, %arg3: memref<1x128xf32, #tpu.memory_space<vmem>>, %arg4: memref<128x128xbf16, #tpu.memory_space<vmem>>, %arg5: memref<1x128xf32, #tpu.memory_space<vmem>>, %arg6: memref<128x8xbf16, #tpu.memory_space<vmem>>, %arg7: memref<1x8xf32, #tpu.memory_space<vmem>>, %arg8: memref<8x8xf32, #tpu.memory_space<vmem>>) attributes {dimension_semantics = [#tpu.dimension_semantics<parallel>], iteration_bounds = array<i64: 1>, scalar_prefetch = 0 : i64, scratch_operands = 0 : i64, tpu.core_type = #tpu.core_type<tc>, window_params = [{transform_indices = @transform_0, window_bounds = array<i64: 8, 9>}, {pipeline_mode = #tpu.pipeline_mode<synchronous>, transform_indices = @transform_1, window_bounds = array<i64: 9, 128>}, {pipeline_mode = #tpu.pipeline_mode<synchronous>, transform_indices = @transform_2, window_bounds = array<i64: 1, 128>}, {pipeline_mode = #tpu.pipeline_mode<synchronous>, transform_indices = @transform_3, window_bounds = array<i64: 128, 128>}, {pipeline_mode = #tpu.pipeline_mode<synchronous>, transform_indices = @transform_4, window_bounds = array<i64: 1, 128>}, {pipeline_mode = #tpu.pipeline_mode<synchronous>, transform_indices = @transform_5, window_bounds = array<i64: 128, 8>}, {pipeline_mode = #tpu.pipeline_mode<synchronous>, transform_indices = @transform_6, window_bounds = array<i64: 1, 8>}, {transform_indices = @transform_7, window_bounds = array<i64: 8, 8>}]} {
    %c0 = arith.constant 0 : index
    %c0_0 = arith.constant 0 : index
    %0 = vector.load %arg1[%c0, %c0_0] : memref<8x9xf32, #tpu.memory_space<vmem>>, vector<8x9xf32>
    %1 = arith.truncf %0 : vector<8x9xf32> to vector<8x9xbf16>
    %c0_1 = arith.constant 0 : index
    %c0_2 = arith.constant 0 : index
    %2 = vector.load %arg2[%c0_1, %c0_2] : memref<9x128xbf16, #tpu.memory_space<vmem>>, vector<9x128xbf16>
    %cst = arith.constant dense<0.000000e+00> : vector<8x128xf32>
    %3 = tpu.matmul %1, %2, %cst {dimension_numbers = #tpu.dot_dimension_numbers<[1], [0], [0], [1], [0, 0, 1, 1], [], []>} : vector<8x9xbf16>, vector<9x128xbf16>, vector<8x128xf32> -> vector<8x128xf32>
    %c0_3 = arith.constant 0 : index
    %c0_4 = arith.constant 0 : index
    %4 = vector.load %arg3[%c0_3, %c0_4] : memref<1x128xf32, #tpu.memory_space<vmem>>, vector<1x128xf32>
    %5 = vector.broadcast %4 : vector<1x128xf32> to vector<8x128xf32>
    %6 = arith.addf %3, %5 : vector<8x128xf32>
    %cst_5 = arith.constant 0.000000e+00 : f32
    %7 = vector.broadcast %cst_5 : f32 to vector<8x128xf32>
    %8 = arith.minimumf %6, %7 : vector<8x128xf32>
    %9 = math.absf %6 : vector<8x128xf32>
    %cst_6 = arith.constant 0.000000e+00 : f32
    %10 = vector.broadcast %cst_6 : f32 to vector<8x128xf32>
    %11 = arith.subf %10, %9 : vector<8x128xf32>
    %12 = math.exp %11 : vector<8x128xf32>
    %13 = math.log1p %12 : vector<8x128xf32>
    %14 = arith.subf %8, %13 : vector<8x128xf32>
    %15 = arith.truncf %14 : vector<8x128xf32> to vector<8x128xbf16>
    %c0_7 = arith.constant 0 : index
    %c0_8 = arith.constant 0 : index
    %16 = vector.load %arg4[%c0_7, %c0_8] : memref<128x128xbf16, #tpu.memory_space<vmem>>, vector<128x128xbf16>
    %cst_9 = arith.constant dense<0.000000e+00> : vector<8x128xf32>
    %17 = tpu.matmul %15, %16, %cst_9 {dimension_numbers = #tpu.dot_dimension_numbers<[1], [0], [0], [1], [0, 0, 1, 1], [], []>} : vector<8x128xbf16>, vector<128x128xbf16>, vector<8x128xf32> -> vector<8x128xf32>
    %c0_10 = arith.constant 0 : index
    %c0_11 = arith.constant 0 : index
    %18 = vector.load %arg5[%c0_10, %c0_11] : memref<1x128xf32, #tpu.memory_space<vmem>>, vector<1x128xf32>
    %19 = vector.broadcast %18 : vector<1x128xf32> to vector<8x128xf32>
    %20 = arith.addf %17, %19 : vector<8x128xf32>
    %cst_12 = arith.constant 0.000000e+00 : f32
    %21 = vector.broadcast %cst_12 : f32 to vector<8x128xf32>
    %22 = arith.minimumf %20, %21 : vector<8x128xf32>
    %23 = math.absf %20 : vector<8x128xf32>
    %cst_13 = arith.constant 0.000000e+00 : f32
    %24 = vector.broadcast %cst_13 : f32 to vector<8x128xf32>
    %25 = arith.subf %24, %23 : vector<8x128xf32>
    %26 = math.exp %25 : vector<8x128xf32>
    %27 = math.log1p %26 : vector<8x128xf32>
    %28 = arith.subf %22, %27 : vector<8x128xf32>
    %29 = arith.truncf %28 : vector<8x128xf32> to vector<8x128xbf16>
    %c0_14 = arith.constant 0 : index
    %c0_15 = arith.constant 0 : index
    %30 = vector.load %arg6[%c0_14, %c0_15] : memref<128x8xbf16, #tpu.memory_space<vmem>>, vector<128x8xbf16>
    %cst_16 = arith.constant dense<0.000000e+00> : vector<8x8xf32>
    %31 = tpu.matmul %29, %30, %cst_16 {dimension_numbers = #tpu.dot_dimension_numbers<[1], [0], [0], [1], [0, 0, 1, 1], [], []>} : vector<8x128xbf16>, vector<128x8xbf16>, vector<8x8xf32> -> vector<8x8xf32>
    %c0_17 = arith.constant 0 : index
    %c0_18 = arith.constant 0 : index
    %32 = vector.load %arg7[%c0_17, %c0_18] : memref<1x8xf32, #tpu.memory_space<vmem>>, vector<1x8xf32>
    %33 = vector.broadcast %32 : vector<1x8xf32> to vector<8x8xf32>
    %34 = arith.addf %31, %33 : vector<8x8xf32>
    %c0_19 = arith.constant 0 : index
    %c0_20 = arith.constant 0 : index
    %35 = vector.load %arg8[%c0_19, %c0_20] : memref<8x8xf32, #tpu.memory_space<vmem>>, vector<8x8xf32>
    tpu.vector_store %arg8[%c0_19, %c0_20], %34 {strides = array<i32>} : memref<8x8xf32, #tpu.memory_space<vmem>>, vector<8x8xf32>,
    return
  }
  func.func @transform_0(%arg0: i32) -> (i32, i32) {
    %c0_i32 = arith.constant 0 : i32
    %c0_i32_0 = arith.constant 0 : i32
    return %arg0, %c0_i32 : i32, i32
  }
  func.func @transform_1(%arg0: i32) -> (i32, i32) {
    %c0_i32 = arith.constant 0 : i32
    %c0_i32_0 = arith.constant 0 : i32
    %c0_i32_1 = arith.constant 0 : i32
    return %c0_i32, %c0_i32_0 : i32, i32
  }
  func.func @transform_2(%arg0: i32) -> (i32, i32) {
    %c0_i32 = arith.constant 0 : i32
    %c0_i32_0 = arith.constant 0 : i32
    %c0_i32_1 = arith.constant 0 : i32
    return %c0_i32, %c0_i32_0 : i32, i32
  }
  func.func @transform_3(%arg0: i32) -> (i32, i32) {
    %c0_i32 = arith.constant 0 : i32
    %c0_i32_0 = arith.constant 0 : i32
    %c0_i32_1 = arith.constant 0 : i32
    return %c0_i32, %c0_i32_0 : i32, i32
  }
  func.func @transform_4(%arg0: i32) -> (i32, i32) {
    %c0_i32 = arith.constant 0 : i32
    %c0_i32_0 = arith.constant 0 : i32
    %c0_i32_1 = arith.constant 0 : i32
    return %c0_i32, %c0_i32_0 : i32, i32
  }
  func.func @transform_5(%arg0: i32) -> (i32, i32) {
    %c0_i32 = arith.constant 0 : i32
    %c0_i32_0 = arith.constant 0 : i32
    %c0_i32_1 = arith.constant 0 : i32
    return %c0_i32, %c0_i32_0 : i32, i32
  }
  func.func @transform_6(%arg0: i32) -> (i32, i32) {
    %c0_i32 = arith.constant 0 : i32
    %c0_i32_0 = arith.constant 0 : i32
    %c0_i32_1 = arith.constant 0 : i32
    return %c0_i32, %c0_i32_0 : i32, i32
  }
  func.func @transform_7(%arg0: i32) -> (i32, i32) {
    %c0_i32 = arith.constant 0 : i32
    %c0_i32_0 = arith.constant 0 : i32
    return %arg0, %c0_i32 : i32, i32
  }
}

</mosaic_0001>

<bundles_post_ra>
// kernel: _mlp_forward.1
= control target key start
LH: loop header
LB: loop body
LE: loop exit
PB: predicated region body
PF: predicated region fallthrough
CT: control target
= control target key end

     0   :  { %12 = vsyncpa [#allocation3], 0  ;;  %s678_s0 = inlined_call_operand.vmem [shape: f32[8,9], index: 0, kind: input, shape index: {}]   ;;  %s679_s1 = inlined_call_operand.hbm [shape: bf16[9,128], index: 1, kind: input, shape index: {}]   ;;  %s680_s2 = inlined_call_operand.vmem [shape: f32[1,128], index: 2, kind: input, shape index: {}]   ;;  %s681_s3 = inlined_call_operand.vmem [shape: bf16[128,128], index: 3, kind: input, shape index: {}]   ;;  %s682_s4 = inlined_call_operand.vmem [shape: f32[1,128], index: 4, kind: input, shape index: {}]   ;;  %s683_s5 = inlined_call_operand.vmem [shape: bf16[128,8], index: 5, kind: input, shape index: {}]   ;;  %s684_s6 = inlined_call_operand.hbm [shape: f32[1,8], index: 6, kind: input, shape index: {}]   ;;  %s685_s7 = inlined_call_operand.vmem [shape: f32[8,8], index: 7, kind: output, shape index: {}]  }
   0x1   :  { %13 = vsyncpa [#allocation5], 0  ;;  %s545_s24 = smov [#allocation2]  }
   0x2   :  { %s21_s25 = sshll.u32 %s545_s24, 4  ;;  %s22_s25 = int_to_ptr.vmem [resolvable:$true] %s21_s25 }
   0x3   :  { %s509_s26 = scalar_lea.vmem %s22_s25, 128  ;;  %p514_p1 = scmp.lt.s32.totalorder %s22_s25, %s22_s25 }
   0x4   :  { %p510_p0 = scmp.ne.s32.totalorder %s22_s25, %s509_s26  ;;  %p515_p2 = scmp.lt.s32.totalorder %s509_s26, %s509_s26 }
   0x6   :  { %p516_p3 = por %p515_p2, %p514_p1 }
   0x8   :  { %p517_p4 = pnand %p516_p3, %p510_p0 }
   0xa   :  { %520 = shalt.err (!%p517_p4)
}
   0xb   :  { %s546_s27 = smov 64   ;;  %s547_s28 = smov 4  }
   0xc   :  { %27 = dma.hbm_to_vmem [thread:$0]  %s679_s1, 128, %s22_s25, [#allocation3], %s546_s27, %s546_s27, %s547_s28  }
   0xd   :  { %s548_s8 = smov [#allocation4]  }
   0xe   :  { %s42_s9 = sshll.u32 %s548_s8, 4  ;;  %s43_s9 = int_to_ptr.vmem [resolvable:$true] %s42_s9 }
   0xf   :  { %s529_s10 = scalar_lea.vmem %s43_s9, 16  ;;  %s533_s11 = scalar_lea.vmem %s43_s9, 32 }
  0x10   :  { %p530_p5 = scmp.ne.s32.totalorder %s43_s9, %s529_s10  ;;  %p534_p6 = scmp.lt.s32.totalorder %s43_s9, %s43_s9 }
  0x11   :  { %p535_p7 = scmp.lt.s32.totalorder %s533_s11, %s529_s10 }
  0x13   :  { %p536_p8 = por %p535_p7, %p534_p6 }
  0x15   :  { %p537_p9 = pnand %p536_p8, %p530_p5 }
  0x17   :  { %540 = shalt.err (!%p537_p9)
}
  0x18   :  { %45 = dma.hbm_to_vmem [thread:$0]  %s684_s6, 16, %s43_s9, [#allocation5]  }
  0x19   :  { %541 = dma.done.wait [#allocation3], 128  }
  0x1a   :  { %542 = vsyncadd [#allocation3], 4294967168 }
  0x1b   :  { %543 = dma.done.wait [#allocation5], 16  }
  0x1c   :  { %544 = vsyncadd [#allocation5], 4294967280  ;;  %vm73_vm0 = vcmask 1043456   ;;  %v549_v0 = vmov 0.0   ;;  %vm550_vm1 = vmmov 0   ;;  %vm74_vm2 = vcmask 1044480  }
  0x1d   :  { %423 = vmatprep.subr.bf16.mxu0 %v549_v0  ;;  %429 = vmatprep.subr.bf16.mxu1 %v549_v0  ;;  %v551_v1 = vmov 65535   ;;  %v476_v4 = vld [vmem:[#allocation2] sm:$0x1f]   ;;  %vm69_vm3 = vcmask 72704   ;;  %v477_v8 = vld [vmem:[%s681_s3 + $0x38] sm:$0xff]   ;;  %v478_v9 = vld [vmem:[%s681_s3 + $0x30] sm:$0xff]  }
  0x1e   :  { %425 = vmatprep.mubr.msk.bf16.mxu0 %vm550_vm1, %v549_v0  ;;  %445 = vmatprep.mubr.msk.bf16.mxu1 %vm550_vm1, %v549_v0  ;;  %v75_v2 = vsel %vm73_vm0, 4294967295, %v551_v1  ;;  %v53_v5 = vld [vmem:[%s678_s0] sm:$0xff]  ;;  %v479_v10 = vld [vmem:[%s681_s3 + $0x28] sm:$0xff]   ;;  %v481_v12 = vld [vmem:[%s681_s3 + $0x18] sm:$0xff]   ;;  %vm374_vm6 = vcmask 64512  }
  0x1f   :  { %v76_v3 = vsel %vm74_vm2, %v75_v2, 0  ;;  %v54_v7 = vpack.c.bf16 %v53_v5, %v53_v5  ;;  %430 = vmatpush3.bf16.msra.mxu1 %v477_v8  ;;  %v480_v11 = vld [vmem:[%s681_s3 + $0x20] sm:$0xff]   ;;  %v482_v13 = vld [vmem:[%s681_s3 + $0x10] sm:$0xff]   ;;  %v483_v14 = vld [vmem:[%s681_s3 + $0x8] sm:$0xff]  }
  0x20   :  { %v78_v6 = vand.u32 %v476_v4, %v76_v3  ;;  %431 = vmatprep.subr.bf16.mxu1 %v549_v0  ;;  %v484_v15 = vld [vmem:[%s681_s3] sm:$0xff]   ;;  %v485_v37 = vld [vmem:[%s683_s5 + $0x38] sm:$0xff]   ;;  %v486_v38 = vld [vmem:[%s683_s5 + $0x30] sm:$0xff]  }
  0x21   :  { %v382_v16 = vld [vmem:[%s680_s2] ss:$0 sm:$0xff]  ;;  %v487_v39 = vld [vmem:[%s683_s5 + $0x28] sm:$0xff]   ;;  %v489_v41 = vld [vmem:[%s683_s5 + $0x18] sm:$0xff]  }
  0x22   :  { %424 = vmatpush3.bf16.msra.mxu0 %v78_v6  ;;  %v488_v40 = vld [vmem:[%s683_s5 + $0x20] sm:$0xff]   ;;  %v490_v42 = vld [vmem:[%s683_s5 + $0x10] sm:$0xff]   ;;  %v491_v43 = vld [vmem:[%s683_s5 + $0x8] sm:$0xff]  }
  0x23   :  { %449 = vmatprep.subr.bf16.mxu0 %v549_v0  ;;  %432 = vmatpush3.bf16.msra.mxu1 %v478_v9  ;;  %v492_v44 = vld [vmem:[%s683_s5] sm:$0xff]   ;;  %v394_v2 = vld [vmem:[#allocation4] ss:$0 sm:$0xff] }
  0x24   :  { %433 = vmatprep.subr.bf16.mxu1 %v549_v0  ;;  %v385_v45 = vld [vmem:[%s682_s4] ss:$0 sm:$0xff] }
  0x25   :  { %426 = vmatmul.mubr.msk.bf16.vlgmr.msra.gmra.mxu0 %vm69_vm3, %v54_v7 }
  0x26   :  { %465 = vmatprep.mubr.msk.bf16.mxu0 %vm550_vm1, %v549_v0  ;;  %450 = vmatpush3.bf16.msra.mxu0 %v485_v37 }
  0x27   :  { %434 = vmatpush3.bf16.msra.mxu1 %v479_v10  ;;  %451 = vmatprep.subr.bf16.mxu0 %v549_v0 }
  0x28   :  { %435 = vmatprep.subr.bf16.mxu1 %v549_v0 }
  0x2a   :  { %452 = vmatpush3.bf16.msra.mxu0 %v486_v38 }
  0x2b   :  { %436 = vmatpush3.bf16.msra.mxu1 %v480_v11  ;;  %453 = vmatprep.subr.bf16.mxu0 %v549_v0 }
  0x2c   :  { %437 = vmatprep.subr.bf16.mxu1 %v549_v0 }
  0x2e   :  { %454 = vmatpush3.bf16.msra.mxu0 %v487_v39 }
  0x2f   :  { %438 = vmatpush3.bf16.msra.mxu1 %v481_v12  ;;  %455 = vmatprep.subr.bf16.mxu0 %v549_v0 }
  0x30   :  { %439 = vmatprep.subr.bf16.mxu1 %v549_v0 }
  0x32   :  { %456 = vmatpush3.bf16.msra.mxu0 %v488_v40 }
  0x33   :  { %440 = vmatpush3.bf16.msra.mxu1 %v482_v13  ;;  %457 = vmatprep.subr.bf16.mxu0 %v549_v0 }
  0x34   :  { %441 = vmatprep.subr.bf16.mxu1 %v549_v0 }
  0x36   :  { %458 = vmatpush3.bf16.msra.mxu0 %v489_v41 }
  0x37   :  { %442 = vmatpush3.bf16.msra.mxu1 %v483_v14  ;;  %459 = vmatprep.subr.bf16.mxu0 %v549_v0 }
  0x38   :  { %443 = vmatprep.subr.bf16.mxu1 %v549_v0 }
  0x3a   :  { %460 = vmatpush3.bf16.msra.mxu0 %v490_v42 }
  0x3b   :  { %444 = vmatpush3.bf16.msra.mxu1 %v484_v15  ;;  %461 = vmatprep.subr.bf16.mxu0 %v549_v0 }
  0x3e   :  { %462 = vmatpush3.bf16.msra.mxu0 %v491_v43 }
  0x3f   :  { %463 = vmatprep.subr.bf16.mxu0 %v549_v0 }
  0x42   :  { %464 = vmatpush3.bf16.msra.mxu0 %v492_v44 }
  0xe5   :  { %v114_v17 = vpop.f32.mrf.mxu0 }
  0xe6   :  { %v115_v18 = vadd.f32 %v382_v16, %v114_v17 }
  0xe7   :  { %v427_v19 = vpop.f32.mrf.mxu0 }
  0xe8   :  { %v121_v20 = vand.u32 2147483647, %v115_v18  ;;  %v120_v33 = vmin.f32 %v115_v18, 0.0 }
  0xe9   :  { %v117_v21 = vpop.f32.mrf.mxu0 }
  0xea   :  { %v122_v22 = vsub.f32 0.0, %v121_v20 }
  0xeb   :  { %v428_v23 = vpop.f32.mrf.mxu0 }
  0xec   :  { %v123_v24 = vmul.f32 1.442695, %v122_v22 }
  0xee   :  { %493 = vpow2.f32 %v123_v24 }
  0xfb   :  { %v494_v25 = vpop.eup %493 }
  0xfc   :  { %v125_v26 = vadd.f32 1.0, %v494_v25  ;;  %v128_v27 = vmul.f32 -0.5, %v494_v25  ;;  %v131_v29 = vand.u32 2147483647, %v494_v25 }
  0xfe   :  { %495 = vlog2.f32 %v125_v26  ;;  %v129_v28 = vadd.f32 1.0, %v128_v27  ;;  %vm132_vm4 = vcmp.lt.f32.partialorder %v131_v29, 0.0004427343 }
 0x100   :  { %v130_v32 = vmul.f32 %v494_v25, %v129_v28 }
 0x10b   :  { %v496_v30 = vpop.eup %495 }
 0x10c   :  { %v127_v31 = vmul.f32 0.6931472, %v496_v30 }
 0x10e   :  { %v133_v34 = vsel %vm132_vm4, %v130_v32, %v127_v31 }
 0x10f   :  { %v134_v35 = vsub.f32 %v120_v33, %v133_v34 }
 0x111   :  { %v135_v36 = vpack.c.bf16 %v134_v35, %v134_v35 }
 0x113   :  { %446 = vmatmul.mubr.bf16.vlgmr.msra.gmra.mxu1 %v135_v36 }
 0x1d3   :  { %v241_v46 = vpop.f32.mrf.mxu1 }
 0x1d4   :  { %v242_v47 = vadd.f32 %v385_v45, %v241_v46 }
 0x1d5   :  { %v447_v48 = vpop.f32.mrf.mxu1 }
 0x1d6   :  { %v248_v49 = vand.u32 2147483647, %v242_v47  ;;  %v247_v62 = vmin.f32 %v242_v47, 0.0 }
 0x1d7   :  { %v244_v50 = vpop.f32.mrf.mxu1 }
 0x1d8   :  { %v249_v51 = vsub.f32 0.0, %v248_v49 }
 0x1d9   :  { %v448_v52 = vpop.f32.mrf.mxu1 }
 0x1da   :  { %v250_v53 = vmul.f32 1.442695, %v249_v51 }
 0x1dc   :  { %497 = vpow2.f32 %v250_v53 }
 0x1e9   :  { %v498_v54 = vpop.eup %497 }
 0x1ea   :  { %v252_v55 = vadd.f32 1.0, %v498_v54  ;;  %v255_v56 = vmul.f32 -0.5, %v498_v54  ;;  %v258_v58 = vand.u32 2147483647, %v498_v54 }
 0x1ec   :  { %499 = vlog2.f32 %v252_v55  ;;  %v256_v57 = vadd.f32 1.0, %v255_v56  ;;  %vm259_vm5 = vcmp.lt.f32.partialorder %v258_v58, 0.0004427343 }
 0x1ee   :  { %v257_v61 = vmul.f32 %v498_v54, %v256_v57 }
 0x1f9   :  { %v500_v59 = vpop.eup %499 }
 0x1fa   :  { %v254_v60 = vmul.f32 0.6931472, %v500_v59 }
 0x1fc   :  { %v260_v63 = vsel %vm259_vm5, %v257_v61, %v254_v60 }
 0x1fd   :  { %v261_v0 = vsub.f32 %v247_v62, %v260_v63 }
 0x1ff   :  { %v262_v1 = vpack.c.bf16 %v261_v0, %v261_v0 }
 0x201   :  { %466 = vmatmul.mubr.bf16.vlgmr.msra.gmra.mxu0 %v262_v1 }
 0x2c1   :  { %v368_v3 = vpop.f32.mrf.mxu0 }
 0x2c2   :  { %v369_v4 = vadd.f32 %v394_v2, %v368_v3 }
 0x2c3   :  { %v467_v5 = vpop.f32.mrf.mxu0 }
 0x2c4   :  { %375 = vst.msk [vmem:[%s685_s7] sm:$0xff] %vm374_vm6, %v369_v4 }
 0x2c5   :  { %v371_v6 = vpop.f32.mrf.mxu0 }
 0x2c7   :  { %v468_v7 = vpop.f32.mrf.mxu0 }
 0x2c8   :  { %380 = vsyncpa [#allocation3], 1 }
 0x2c9   :  { %381 = vsyncpa [#allocation5], 1 }

</bundles_post_ra>
